<compile_context>
chip_gen: v6e
topology: v6e:2x2x1
jax: 0.10.0
libtpu: 0.0.40
codegen_flags: <defaults>
</compile_context>

<pallas_src>
import jax
import jax.numpy as jnp
from jax.experimental import pallas as pl
from jax.experimental.pallas import tpu as pltpu


def _scale3d_kernel(x_ref, g_ref, b_ref, o_ref):
    # x_ref/o_ref: (TR, TS) VMEM tiles; g_ref/b_ref: (TR, 1) per-row params,
    # broadcast across the lane axis for free on the VPU.
    o_ref[...] = (x_ref[...] * g_ref[...] + b_ref[...]).astype(o_ref.dtype)


def _round_up(a, b):
    return pl.cdiv(a, b) * b


def scale3d(x, gamma, beta, *, block_byte_budget=3 << 20, max_lane_tile=8192):
    """y[:, i] = x[:, i] * gamma[i] + beta[i] for 5-D x of shape (N, C, D, H, W)."""
    N, C, D, H, W = x.shape
    R = N * C                       # fused row axis
    S = D * H * W                   # fused lane axis

    # Free row-major 2-D view of contiguous NCDHW.
    x2 = x.reshape(R, S)

    # Per-row affine params in x.dtype (row r = (n, c) uses channel c = r % C).
    gamma_rows = jnp.tile(gamma.astype(x.dtype), N).reshape(R, 1)
    beta_rows = jnp.tile(beta.astype(x.dtype), N).reshape(R, 1)

    # --- Byte-budget-driven tile selection -------------------------------
    itemsize = jnp.dtype(x.dtype).itemsize
    sub = 8 * max(1, 4 // itemsize)     # sublane packing: 8 f32, 16 bf16, 32 i8
    S_pad128 = _round_up(S, 128)

    # Lane tile: prefer full-extent S (legal for any S, no ragged lane tail)
    # whenever a minimal-height block fits the budget; otherwise a large
    # multiple of 128 (unmasked vst) capped by budget and max_lane_tile.
    if S_pad128 * sub * itemsize <= block_byte_budget and S_pad128 <= max_lane_tile:
        TS = S
    else:
        ts_cap = max(128, (block_byte_budget // (sub * itemsize)) // 128 * 128)
        TS = min(S_pad128, max_lane_tile, ts_cap)

    # Row tile: fill the remaining byte budget, rounded to the sublane packing.
    row_bytes = _round_up(TS, 128) * itemsize
    TR = max(sub, (block_byte_budget // row_bytes) // sub * sub)
    if TR >= R:
        TR = R                          # full-extent row block is always legal

    # Keep >= 2 blocks along at least one parallel axis when possible, so the
    # grid can shard across megacore / v7x's two TensorCores.
    if pl.cdiv(R, TR) * pl.cdiv(S, TS) == 1:
        if R > sub:
            TR = _round_up(pl.cdiv(R, 2), sub)
        elif S > 128:
            TS = _round_up(pl.cdiv(S, 2), 128)

    grid = (pl.cdiv(R, TR), pl.cdiv(S, TS))   # S is the inner (fast) axis

    out = pl.pallas_call(
        _scale3d_kernel,
        out_shape=jax.ShapeDtypeStruct((R, S), x.dtype),
        grid=grid,
        in_specs=[
            pl.BlockSpec((TR, TS), lambda i, j: (i, j)),   # x tile
            pl.BlockSpec((TR, 1), lambda i, j: (i, 0)),    # gamma column (reused over j)
            pl.BlockSpec((TR, 1), lambda i, j: (i, 0)),    # beta column  (reused over j)
        ],
        out_specs=pl.BlockSpec((TR, TS), lambda i, j: (i, j)),
        compiler_params=pltpu.CompilerParams(
            dimension_semantics=("parallel", "parallel"),
        ),
    )(x2, gamma_rows, beta_rows)

    return out.reshape(N, C, D, H, W)


if __name__ == "__main__":
    key = jax.random.PRNGKey(0)

    # Small shapes consistent with the module: 5-D input (N, C, D, H, W).
    N, C, D, H, W = 2, 4, 4, 8, 16
    x = jax.random.normal(key, (N, C, D, H, W), dtype=jnp.float32)

    # Deterministic parameter init per Scale3d.__init__: gamma=ones, beta=zeros.
    gamma = jnp.ones((C,), dtype=jnp.float32)
    beta = jnp.zeros((C,), dtype=jnp.float32)

    y = scale3d(x, gamma, beta)
    y = jax.block_until_ready(y)

    # Reference (plain JAX) check of the per-channel affine transform.
    ref = x * gamma.reshape(1, C, 1, 1, 1) + beta.reshape(1, C, 1, 1, 1)
    assert y.shape == x.shape and y.dtype == x.dtype
    assert jnp.allclose(y, ref, atol=1e-6), "mismatch vs reference"

    # Second check: non-trivial gamma/beta and a ragged spatial size
    # (S = 3*5*7 = 105, not a multiple of 128 -> full-extent lane block path).
    k1, k2, k3 = jax.random.split(key, 3)
    gamma2 = jax.random.normal(k1, (C,), dtype=jnp.float32)
    beta2 = jax.random.normal(k2, (C,), dtype=jnp.float32)
    x2 = jax.random.normal(k3, (N, C, 3, 5, 7), dtype=jnp.float32)
    y2 = jax.block_until_ready(scale3d(x2, gamma2, beta2))
    ref2 = x2 * gamma2.reshape(1, C, 1, 1, 1) + beta2.reshape(1, C, 1, 1, 1)
    assert jnp.allclose(y2, ref2, atol=1e-5), "mismatch vs reference (ragged path)"

    print("KERNEL_OK")
</pallas_src>

<mosaic_0001>
module attributes {stable_mosaic.version = 11 : i64} {
  func.func @_scale3d_kernel(%arg0: i32, %arg1: i32, %arg2: memref<8x256xf32, #tpu.memory_space<vmem>>, %arg3: memref<8x1xf32, #tpu.memory_space<vmem>>, %arg4: memref<8x1xf32, #tpu.memory_space<vmem>>, %arg5: memref<8x256xf32, #tpu.memory_space<vmem>>) attributes {dimension_semantics = [#tpu.dimension_semantics<parallel>, #tpu.dimension_semantics<parallel>], iteration_bounds = array<i64: 1, 2>, scalar_prefetch = 0 : i64, scratch_operands = 0 : i64, tpu.core_type = #tpu.core_type<tc>, window_params = [{transform_indices = @transform_0, window_bounds = array<i64: 8, 256>}, {transform_indices = @transform_1, window_bounds = array<i64: 8, 1>}, {transform_indices = @transform_2, window_bounds = array<i64: 8, 1>}, {transform_indices = @transform_3, window_bounds = array<i64: 8, 256>}]} {
    %c0 = arith.constant 0 : index
    %c0_0 = arith.constant 0 : index
    %0 = vector.load %arg2[%c0, %c0_0] : memref<8x256xf32, #tpu.memory_space<vmem>>, vector<8x256xf32>
    %c0_1 = arith.constant 0 : index
    %c0_2 = arith.constant 0 : index
    %1 = vector.load %arg3[%c0_1, %c0_2] : memref<8x1xf32, #tpu.memory_space<vmem>>, vector<8x1xf32>
    %2 = vector.broadcast %1 : vector<8x1xf32> to vector<8x256xf32>
    %3 = arith.mulf %0, %2 : vector<8x256xf32>
    %c0_3 = arith.constant 0 : index
    %c0_4 = arith.constant 0 : index
    %4 = vector.load %arg4[%c0_3, %c0_4] : memref<8x1xf32, #tpu.memory_space<vmem>>, vector<8x1xf32>
    %5 = vector.broadcast %4 : vector<8x1xf32> to vector<8x256xf32>
    %6 = arith.addf %3, %5 : vector<8x256xf32>
    %c0_5 = arith.constant 0 : index
    %c0_6 = arith.constant 0 : index
    %7 = vector.load %arg5[%c0_5, %c0_6] : memref<8x256xf32, #tpu.memory_space<vmem>>, vector<8x256xf32>
    tpu.vector_store %arg5[%c0_5, %c0_6], %6 {strides = array<i32>} : memref<8x256xf32, #tpu.memory_space<vmem>>, vector<8x256xf32>,
    return
  }
  func.func @transform_0(%arg0: i32, %arg1: i32) -> (i32, i32) {
    %c0_i32 = arith.constant 0 : i32
    return %arg0, %arg1 : i32, i32
  }
  func.func @transform_1(%arg0: i32, %arg1: i32) -> (i32, i32) {
    %c0_i32 = arith.constant 0 : i32
    %c0_i32_0 = arith.constant 0 : i32
    return %arg0, %c0_i32 : i32, i32
  }
  func.func @transform_2(%arg0: i32, %arg1: i32) -> (i32, i32) {
    %c0_i32 = arith.constant 0 : i32
    %c0_i32_0 = arith.constant 0 : i32
    return %arg0, %c0_i32 : i32, i32
  }
  func.func @transform_3(%arg0: i32, %arg1: i32) -> (i32, i32) {
    %c0_i32 = arith.constant 0 : i32
    return %arg0, %arg1 : i32, i32
  }
}

</mosaic_0001>

<bundles_post_ra>
// kernel: tpu_custom_call.1
= control target key start
LH: loop header
LB: loop body
LE: loop exit
PB: predicated region body
PF: predicated region fallthrough
CT: control target
= control target key end

     0   :  { %8 = vsyncpa [#allocation3], 0  ;;  %s754_s0 = inlined_call_operand.hbm [shape: f32[8,512], index: 0, kind: input, shape index: {}]   ;;  %s755_s1 = inlined_call_operand.vmem [shape: f32[8,1], index: 1, kind: input, shape index: {}]   ;;  %s756_s2 = inlined_call_operand.vmem [shape: f32[8,1], index: 2, kind: input, shape index: {}]   ;;  %s757_s3 = inlined_call_operand.hbm [shape: f32[8,512], index: 3, kind: output, shape index: {}]  }
   0x1   :  { %10 = vsyncpa [#allocation3 + $0x1], 0 }
   0x2   :  { %11 = vsyncpa [#allocation4], 0 }
   0x3   :  { %13 = vsyncpa [#allocation4 + $0x1], 0  ;;  %s608_s12 = smov 0   ;;  %s610_s13 = smov 0  }
   0x4   :  { %s612_s14 = smov 0   ;;  %s614_s15 = smov 0  }
   0x5   :  { %s616_s16 = smov 0   ;;  %s618_s17 = smov 0  }
   0x6 LB: > { %s392_s18 = sadd.s32 4294967295, %s583_s17   ;;  %s393_s19 = sadd.s32 4294967294, %s583_s17   ;;  %s583_s17 = sphi %s618_s17, %s19_s17   ;;  %s579_s16 = sphi %s616_s16, %s769_s16   ;;  %s575_s15 = sphi %s614_s15, %s768_s15   ;;  %s571_s14 = sphi %s612_s14, %s767_s14   ;;  %s567_s13 = sphi %s610_s13, %s766_s13   ;;  %s563_s12 = sphi %s608_s12, %s765_s12  }
   0x7   : > { %s28_s20 = sadd.s32 1, %s579_s16  ;;  %s40_s21 = sadd.s32 1, %s571_s14 }
   0x8   : > { %p29_p0 = scmp.ge.s32.totalorder %s28_s20, 2  ;;  %p47_p1 = scmp.ne.s32.totalorder %s571_s14, %s567_s13 }
   0x9   : > { %p48_p2 = scmp.eq.s32.totalorder %s583_s17, 0  ;;  %p53_p3 = scmp.ne.s32.totalorder %s567_s13, %s563_s12 }
   0xa   : > { %s771_s20 = smov (%p29_p0, %s28_s20), 0  ;;  %p54_p5 = scmp.eq.s32.totalorder %s392_s18, 0 }
   0xb   : > { %p649_p4 = por %p48_p2, %p47_p1  ;;  %s36_s23 = ssub.s32 %s579_s16, %s771_s20 }
   0xc   : > { %p131_p6 = scmp.eq.s32.totalorder %s392_s18, 1  ;;  %p38_p7 = scmp.eq.s32.totalorder %s36_s23, 0 }
   0xd   : > { %p655_p8 = por %p54_p5, %p53_p3  ;;  %p137_p10 = scmp.eq.s32.totalorder %s393_s19, 1 }
   0xe   : > { %p659_p9 = por %p131_p6, %p47_p1  ;;  %p423_p13 = scmp.lt.s32.totalorder %s583_s17, 2 }
   0xf   : > { %s664_s26 = scalar_select %p38_p7, %s571_s14, %s40_s21  }
  0x10   : > { %p666_p11 = por %p137_p10, %p53_p3  ;;  %s171_s28 = sand.u32 1, %s571_s14  }
  0x11   : > { %s398_s29 = sshll.u32 %s171_s28, 4  ;;  %s409_s30 = sshll.u32 %s579_s16, 8 }
  0x12   : > { %s761_s27 = scalar_select %p666_p11, 1, 0 }
  0x13   : > { %s183_s6 = scalar_lea.hbm %s754_s0, %s409_s30  ;;  %s175_s7 = scalar_lea.vmem [#allocation2], %s398_s29 }
  0x14   : > { %s185_s8 = sshll.u32 %s175_s7, 4  ;;  %p679_p0 = pnand %p423_p13, %p649_p4  ;;  %s186_s8 = int_to_ptr.vmem [resolvable:$true] %s185_s8 }
  0x15   : > { %p401_p1 = scmp.ge.s32.totalorder %s583_s17, 1  ;;  %p190_p2 = scmp.lt.s32.totalorder %s583_s17, 3 }
  0x16   : > { %s172_s10 = scalar_lea.sflag [#allocation3], %s171_s28  ;;  %p477_p3 = pneg %p679_p0 }
  0x17   : > { %s488_s11 = scalar_lea.vmem %s186_s8, 256  ;;  %s585_s18 = smov [#allocation2]  }
  0x18   : > { %p489_p5 = scmp.ne.s32.totalorder %s186_s8, %s488_s11  ;;  %s493_s19 = sshll.u32 %s585_s18, 4  ;;  %s494_s19 = int_to_ptr.vmem [resolvable:$false] %s493_s19 }
  0x19   : > { %s495_s21 = scalar_lea.vmem %s494_s19, 512  ;;  %p496_p10 = scmp.lt.s32.totalorder %s186_s8, %s494_s19 }
  0x1a   : > { %p491_p6 = pnand %p489_p5, %p477_p3  ;;  %p497_p12 = scmp.lt.s32.totalorder %s495_s21, %s488_s11 }
  0x1c   : > { %p492_p7 = pneg %p491_p6  ;;  %p498_p4 = por %p497_p12, %p496_p10 }
  0x1e   : > { %p499_p13 = pnand %p498_p4, %p492_p7 }
  0x20   : > { %502 = shalt.err (!%p499_p13)
}
  0x21   : > { %418 = dma.hbm_to_vmem [thread:$0]  (!%p679_p0), %s183_s6, 256, %s186_s8, %s172_s10  }
  0x22   : > { %p191_p11 = pnand %p401_p1, %p190_p2 }
  0x23   : > { %s694_s22 = sand.u32 (!%p191_p11), 1, %s567_s13  }
  0x24   : > { %194 = sbr.rel (%p191_p11) target bundleno = 187 (0xbb), region = 32  ;;  %s402_s23 = sshll.u32 (!%p191_p11), %s694_s22, 4 }
  0x25   : > { %s197_s28 = scalar_lea.sflag (!%p191_p11), [#allocation3], %s694_s22  ;;  %s200_s29 = scalar_lea.vmem (!%p191_p11), [#allocation2], %s402_s23 }
  0x29   : > { %554 = dma.done.wait (%p655_p8), %s197_s28, 256  }
  0x2a   : > { %556 = vsyncadd (%p655_p8), %s197_s28, 4294967040  ;;  %v586_v0 = vmov 0   ;;  %v243_v1 = vld [vmem:[%s755_s1] sm:$0xff]  ;;  %v242_v5 = vld [vmem:[%s200_s29 + $0x8] sm:$0xff]  ;;  %s410_s24 = sshll.u32 %s575_s15, 8  ;;  %s230_s7 = scalar_lea.vmem [#allocation5], %s402_s23 }
  0x2b   : > { %474 = vset.pattern.permute.xlu0 %v586_v0  ;;  %v251_v2 = vld [vmem:[%s756_s2] sm:$0xff]  ;;  %s278_s8 = sshll.u32 %s230_s7, 4  ;;  %s712_s11 = scalar_lea.hbm %s757_s3, %s410_s24  ;;  %s279_s8 = int_to_ptr.vmem [resolvable:$true] %s278_s8 }
  0x2c   : > { %246 = vperm.xlu0 %474, %v243_v1   ;;  %v241_v4 = vld [vmem:[%s200_s29] sm:$0xff]  ;;  %s262_s18 = scalar_lea.sflag [#allocation4], %s694_s22  ;;  %s503_s19 = scalar_lea.vmem %s279_s8, 256 }
  0x2d   : > { %p504_p8 = scmp.ne.s32.totalorder %s279_s8, %s503_s19  ;;  %s587_s15 = smov [#allocation5]  }
  0x2e   : > { %s507_s21 = sshll.u32 %s587_s15, 4  ;;  %s508_s21 = int_to_ptr.vmem [resolvable:$false] %s507_s21 }
  0x2f   : > { %p505_p11 = pnand %p504_p8, %p659_p9  ;;  %s509_s23 = scalar_lea.vmem %s508_s21, 512 }
  0x30   : > { %254 = vperm.xlu0 %474, %v251_v2   ;;  %p510_p0 = scmp.lt.s32.totalorder %s279_s8, %s508_s21  ;;  %p511_p1 = scmp.lt.s32.totalorder %s509_s23, %s503_s19 }
  0x31   : > { %p506_p12 = pneg %p505_p11 }
  0x32   : > { %p512_p2 = por %p511_p1, %p510_p0 }
  0x34   : > { %p513_p3 = pnand %p512_p2, %p506_p12 }
  0xa7   : > { %v247_v3 = vpop.permute.xlu0 %246 }
  0xa8   : > { %v249_v6 = vmul.f32 %v247_v3, %v241_v4  ;;  %v250_v7 = vmul.f32 %v247_v3, %v242_v5 }
  0xab   : > { %v255_v8 = vpop.permute.xlu0 %254 }
  0xac   : > { %v257_v9 = vadd.f32 %v255_v8, %v249_v6  ;;  %v258_v10 = vadd.f32 %v255_v8, %v250_v7 }
  0xae   : > { %259 = vst [vmem:[%s230_s7] sm:$0xff] %v257_v9  ;;  %260 = vst [vmem:[%s230_s7 + $0x8] sm:$0xff] %v258_v10 }
  0xaf   : > { %516 = shalt.err (!%p513_p3)
}
  0xb0   : > { %s517_s28 = scalar_lea.hbm %s712_s11, 256  ;;  %s521_s30 = scalar_lea.hbm %s757_s3, 512 }
  0xb1   : > { %p518_p5 = scmp.ne.s32.totalorder %s712_s11, %s517_s28  ;;  %p522_p10 = scmp.lt.s32.totalorder %s712_s11, %s757_s3 }
  0xb2   : > { %p523_p4 = scmp.lt.s32.totalorder %s521_s30, %s517_s28 }
  0xb3   : > { %p519_p6 = pnand %p518_p5, %p659_p9 }
  0xb4   : > { %p524_p13 = por %p523_p4, %p522_p10 }
  0xb5   : > { %p520_p7 = pneg %p519_p6 }
  0xb7   : > { %p525_p8 = pnand %p524_p13, %p520_p7 }
  0xb9   : > { %528 = shalt.err (!%p525_p8)
}
  0xba   : > { %413 = dma.vmem_to_hbm [thread:$0]  (%p659_p9), %s279_s8, 256, %s712_s11, %s262_s18  }
  0xbb PF: > { %s290_s6 = sand.u32 1, %s563_s12   ;;  %p763_p11 = scmp.ne.s32.totalorder %s761_s27, 0 }
  0xbc   : > { %p764_p12 = scmp.ge.s32.totalorder %s583_s17, 2  ;;  %s291_s24 = scalar_lea.sflag [#allocation4], %s290_s6 }
  0xbe   : > { %p420_p0 = pnand %p764_p12, %p763_p11 }
  0xc0   : > { %p421_p1 = pneg %p420_p0 }
  0xc2   : > { %558 = dma.done.wait (%p421_p1), %s291_s24, 256  }
  0xc3   : > { %560 = vsyncadd (%p421_p1), %s291_s24, 4294967040  ;;  %s19_s17 = sadd.s32 1, %s583_s17   ;;  %s765_s12 = smov %s567_s13 }
  0xc4   : > { %p16_p2 = scmp.ge.s32.totalorder %s19_s17, 4   ;;  %s766_s13 = smov %s571_s14 }
  0xc5   : > { %s767_s14 = smov %s664_s26  ;;  %s768_s15 = smov %s579_s16 }
  0xc6   : > { %s769_s16 = smov %s771_s20  ;;  %18 = sbr.rel (!%p16_p2) target bundleno = 6 (0x6), region = 83 }
  0xcb   :  { %296 = vsyncpa [#allocation3], 1 }
  0xcc   :  { %298 = vsyncpa [#allocation3 + $0x1], 1 }
  0xcd   :  { %299 = vsyncpa [#allocation4], 1 }
  0xce   :  { %301 = vsyncpa [#allocation4 + $0x1], 1 }

</bundles_post_ra>
